<compile_context>
chip_gen: v7x
topology: tpu7x:2x2x1
jax: 0.10.0
libtpu: 0.0.40
codegen_flags: <defaults>
</compile_context>

<pallas_src>
import functools

import jax
import jax.numpy as jnp
from jax.experimental import pallas as pl
from jax.experimental.pallas import tpu as pltpu

_LANE = 128


def _softmax_kernel(x_ref, o_ref, *, approx: bool):
    # Single f32 working copy; `e` is reused for the final multiply so at most
    # one extra f32 tile is live alongside the cast input.
    x = x_ref[...].astype(jnp.float32)
    m = jnp.max(x, axis=-1, keepdims=True)
    e = jnp.exp(x - m)
    s = jnp.sum(e, axis=-1, keepdims=True)
    if approx:
        # EUP vrcp (free bundle slot) -- ~1e-3 relative error, opt-in only.
        o = e * pl.reciprocal(s, approx=True)
    else:
        # Exact normalization (default); softmax is memory-bound so this is
        # not on the critical path.
        o = e / s
    o_ref[...] = o.astype(o_ref.dtype)


def softmax(x: jax.Array, *, tile_n: int | None = None,
            approx: bool = False) -> jax.Array:
    """Row-wise softmax over axis=1 of a 2D array [N, D]."""
    assert x.ndim == 2, "Softmax.forward expects a 2D [batch, features] input"
    N, D = x.shape
    itemsize = jnp.dtype(x.dtype).itemsize

    # Lane-dense feature axis: pad D up to a multiple of 128.
    D_pad = pl.cdiv(D, _LANE) * _LANE

    # Row multiple from sublane packing of the I/O dtype (8 f32 / 16 bf16 / 32 i8).
    row_mult = 8 * max(1, 4 // itemsize)

    if tile_n is None:
        # Target ~2 MiB of f32 work per block (mem-bound sweet spot 1-4 MiB).
        target_bytes = 2 << 20
        rows = max(row_mult, (target_bytes // (D_pad * 4)) // row_mult * row_mult)
        # Prefer >= 2 grid steps when the batch allows it (pipelining overlap
        # and megacore sharding via dimension_semantics="parallel").
        if N >= 2 * row_mult:
            half = pl.cdiv(pl.cdiv(N, 2), row_mult) * row_mult
            rows = min(rows, max(row_mult, half))
        tile_n = min(rows, pl.cdiv(N, row_mult) * row_mult)
    else:
        tile_n = pl.cdiv(tile_n, row_mult) * row_mult

    # Pad the batch so tile_n divides it evenly (last block handled by padding
    # rather than a masked partial block).
    N_pad = pl.cdiv(N, tile_n) * tile_n
    pad_n, pad_d = N_pad - N, D_pad - D
    if pad_n or pad_d:
        # Large-negative (finite) fill: exp(fill - rowmax) == 0, so padded
        # columns contribute nothing to the row sums; padded rows are sliced off.
        x_in = jnp.pad(x, ((0, pad_n), (0, pad_d)), constant_values=-1e30)
    else:
        x_in = x

    # Explicit VMEM budget: 2x double-buffered input + 2x output blocks plus
    # ~2 live f32 tile intermediates + headroom; capped under v7x's 64 MiB/TC.
    block_io = tile_n * D_pad * itemsize
    f32_block = tile_n * D_pad * 4
    vmem_bytes = 4 * block_io + 2 * f32_block + (2 << 20)
    vmem_bytes = int(min(max(vmem_bytes, 16 << 20), 48 << 20))

    grid = (N_pad // tile_n,)

    # TODO(synk): for vocab-sized D where even an 8-row tile exceeds VMEM, add a
    # second "arbitrary" grid axis over D with an online-softmax accumulator.
    out = pl.pallas_call(
        functools.partial(_softmax_kernel, approx=approx),
        out_shape=jax.ShapeDtypeStruct((N_pad, D_pad), x.dtype),
        grid_spec=pltpu.PrefetchScalarGridSpec(
            num_scalar_prefetch=0,
            grid=grid,
            in_specs=[pl.BlockSpec((tile_n, D_pad), lambda i: (i, 0))],
            out_specs=pl.BlockSpec((tile_n, D_pad), lambda i: (i, 0)),
        ),
        compiler_params=pltpu.CompilerParams(
            dimension_semantics=("parallel",),
            vmem_limit_bytes=vmem_bytes,
        ),
    )(x_in)

    if pad_n or pad_d:
        out = out[:N, :D]
    return out


if __name__ == "__main__":
    key = jax.random.PRNGKey(0)

    # Small shape consistent with the module's forward: [batch, features].
    N, D = 8, 32
    x = jax.random.normal(key, (N, D), dtype=jnp.float32)
    y = jax.block_until_ready(softmax(x))

    ref = jnp.exp(x) / jnp.sum(jnp.exp(x), axis=1, keepdims=True)
    assert y.shape == x.shape and y.dtype == x.dtype
    # Exact normalization -> tight tolerances.
    assert jnp.allclose(y, ref, atol=1e-5, rtol=1e-5)
    assert jnp.allclose(jnp.sum(y, axis=1), jnp.ones((N,)), atol=1e-5)

    # Second check exercising row tiling (grid > 1) + lane/row padding paths.
    key2 = jax.random.PRNGKey(1)
    N2, D2 = 300, 200
    x2 = jax.random.normal(key2, (N2, D2), dtype=jnp.float32) * 3.0
    y2 = jax.block_until_ready(softmax(x2))
    ref2 = jnp.exp(x2) / jnp.sum(jnp.exp(x2), axis=1, keepdims=True)
    assert y2.shape == x2.shape and y2.dtype == x2.dtype
    assert jnp.allclose(y2, ref2, atol=1e-5, rtol=1e-5)
    assert jnp.allclose(jnp.sum(y2, axis=1), jnp.ones((N2,)), atol=1e-5)

    print("KERNEL_OK")
</pallas_src>

<mosaic_0001>
module attributes {stable_mosaic.version = 11 : i64} {
  func.func @_softmax_kernel(%arg0: i32, %arg1: memref<8x128xf32, #tpu.memory_space<vmem>>, %arg2: memref<8x128xf32, #tpu.memory_space<vmem>>) attributes {dimension_semantics = [#tpu.dimension_semantics<parallel>], iteration_bounds = array<i64: 1>, scalar_prefetch = 0 : i64, scratch_operands = 0 : i64, tpu.core_type = #tpu.core_type<tc>, window_params = [{transform_indices = @transform_0, window_bounds = array<i64: 8, 128>}, {transform_indices = @transform_1, window_bounds = array<i64: 8, 128>}]} {
    %c0 = arith.constant 0 : index
    %c0_0 = arith.constant 0 : index
    %0 = vector.load %arg1[%c0, %c0_0] : memref<8x128xf32, #tpu.memory_space<vmem>>, vector<8x128xf32>
    %cst = arith.constant dense<0xFF800000> : vector<8xf32>
    %1 = vector.multi_reduction <maximumf>, %0, %cst [1] : vector<8x128xf32> to vector<8xf32>
    %2 = vector.shape_cast %1 : vector<8xf32> to vector<8x1xf32>
    %3 = vector.broadcast %2 : vector<8x1xf32> to vector<8x128xf32>
    %4 = arith.subf %0, %3 : vector<8x128xf32>
    %5 = math.exp %4 : vector<8x128xf32>
    %cst_1 = arith.constant dense<0.000000e+00> : vector<8xf32>
    %6 = vector.multi_reduction <add>, %5, %cst_1 [1] : vector<8x128xf32> to vector<8xf32>
    %7 = vector.shape_cast %6 : vector<8xf32> to vector<8x1xf32>
    %8 = vector.broadcast %7 : vector<8x1xf32> to vector<8x128xf32>
    %9 = arith.divf %5, %8 : vector<8x128xf32>
    %c0_2 = arith.constant 0 : index
    %c0_3 = arith.constant 0 : index
    %10 = vector.load %arg2[%c0_2, %c0_3] : memref<8x128xf32, #tpu.memory_space<vmem>>, vector<8x128xf32>
    tpu.vector_store %arg2[%c0_2, %c0_3], %9 {strides = array<i32>} : memref<8x128xf32, #tpu.memory_space<vmem>>, vector<8x128xf32>,
    return
  }
  func.func @transform_0(%arg0: i32) -> (i32, i32) {
    %c0_i32 = arith.constant 0 : i32
    %c0_i32_0 = arith.constant 0 : i32
    return %arg0, %c0_i32 : i32, i32
  }
  func.func @transform_1(%arg0: i32) -> (i32, i32) {
    %c0_i32 = arith.constant 0 : i32
    %c0_i32_0 = arith.constant 0 : i32
    return %arg0, %c0_i32 : i32, i32
  }
}

</mosaic_0001>

<bundles_post_ra>
// kernel: tpu_custom_call.1
= control target key start
LH: loop header
LB: loop body
LE: loop exit
PB: predicated region body
PF: predicated region fallthrough
CT: control target
= control target key end

     0   :  { %6 = vsyncpa [#allocation3], 0  ;;  %s137_s0 = inlined_call_operand.hbm [shape: f32[8,128], index: 0, kind: input, shape index: {}]   ;;  %s138_s1 = inlined_call_operand.hbm [shape: f32[8,128], index: 1, kind: output, shape index: {}]  }
   0x1   :  { %7 = vsyncpa [#allocation4], 0  ;;  %s101_s6 = smov [#allocation2]   ;;  %s53_s10 = scalar_lea.hbm %s137_s0, 128 }
   0x2   :  { %s14_s7 = sshll.u32 %s101_s6, 4  ;;  %p54_p0 = scmp.ne.s32.totalorder %s137_s0, %s53_s10  ;;  %s15_s7 = int_to_ptr.vmem [resolvable:$true] %s14_s7 }
   0x3   :  { %p57_p1 = scmp.lt.u32.totalorder %s53_s10, %s137_s0 }
   0x5   :  { %p59_p2 = pnand %p57_p1, %p54_p0 }
   0x7   :  { %62 = shalt.err (!%p59_p2)
}
   0x8   :  { %s63_s15 = scalar_lea.vmem %s15_s7, 128  ;;  %p68_p4 = scmp.lt.s32.totalorder %s15_s7, %s15_s7 }
   0x9   :  { %p64_p3 = scmp.ne.s32.totalorder %s15_s7, %s63_s15  ;;  %p69_p5 = scmp.lt.s32.totalorder %s63_s15, %s63_s15 }
   0xb   :  { %p70_p6 = por %p69_p5, %p68_p4 }
   0xd   :  { %p71_p7 = pnand %p70_p6, %p64_p3 }
   0xf   :  { %74 = shalt.err (!%p71_p7)
}
  0x10   :  { %17 = dma.hbm_to_vmem [thread:$0]  %s137_s0, 128, %s15_s7, [#allocation3]  }
  0x11   :  { %97 = dma.done.wait [#allocation3], 128  }
  0x12   :  { %98 = vsyncadd [#allocation3], 4294967168  ;;  %v21_v0 = vld [vmem:[#allocation2] sm:$0xff]  ;;  %s102_s18 = smov [#allocation5]  }
  0x13   :  { %22 = vmax.xlane.f32.xlu0 %v21_v0  ;;  %s38_s19 = sshll.u32 %s102_s18, 4  ;;  %s39_s19 = int_to_ptr.vmem [resolvable:$true] %s38_s19 }
  0x14   :  { %s75_s20 = scalar_lea.vmem %s39_s19, 128  ;;  %p80_p9 = scmp.lt.s32.totalorder %s39_s19, %s39_s19 }
  0x15   :  { %p76_p8 = scmp.ne.s32.totalorder %s39_s19, %s75_s20  ;;  %p81_p10 = scmp.lt.s32.totalorder %s75_s20, %s75_s20 }
  0x17   :  { %p82_p11 = por %p81_p10, %p80_p9 }
  0x19   :  { %p83_p12 = pnand %p82_p11, %p76_p8 }
  0xa0   :  { %v23_v1 = vpop.xlane.xlu0 %22 }
  0xa1   :  { %v24_v2 = vsub.f32 %v21_v0, %v23_v1 }
  0xa3   :  { %v25_v3 = vmul.f32 1.442695, %v24_v2 }
  0xa5   :  { %49 = vpow2.f32 %v25_v3 }
  0xaf   :  { %v50_v4 = vpop.eup %49 }
  0xb0   :  { %27 = vadd.xlane.f32.xlu0 %v50_v4 }
 0x13d   :  { %v28_v5 = vpop.xlane.xlu0 %27 }
 0x13e   :  { %51 = vrcp.f32 %v28_v5 }
 0x148   :  { %v52_v6 = vpop.eup %51 }
 0x149   :  { %v30_v7 = vmul.f32 %v52_v6, %v50_v4 }
 0x14b   :  { %31 = vst [vmem:[#allocation5] sm:$0xff] %v30_v7 }
 0x14c   :  { %86 = shalt.err (!%p83_p12)
}
 0x14d   :  { %s87_s22 = scalar_lea.hbm %s138_s1, 128 }
 0x14e   :  { %p88_p13 = scmp.ne.s32.totalorder %s138_s1, %s87_s22  ;;  %p91_p0 = scmp.lt.u32.totalorder %s87_s22, %s138_s1 }
 0x150   :  { %p93_p1 = pnand %p91_p0, %p88_p13 }
 0x152   :  { %96 = shalt.err (!%p93_p1)
}
 0x153   :  { %41 = dma.vmem_to_hbm [thread:$0]  %s39_s19, 128, %s138_s1, [#allocation4]  }
 0x154   :  { %99 = dma.done.wait [#allocation4], 128  }
 0x155   :  { %100 = vsyncadd [#allocation4], 4294967168 }
 0x156   :  { %45 = vsyncpa [#allocation3], 1 }
 0x157   :  { %46 = vsyncpa [#allocation4], 1 }

</bundles_post_ra>
